<compile_context>
chip_gen: v6e
topology: v6e:2x2x1
jax: 0.10.0
libtpu: 0.0.40
codegen_flags: <defaults>
</compile_context>

<pallas_src>
import jax
import jax.numpy as jnp
from jax.experimental import pallas as pl
from jax.experimental.pallas import tpu as pltpu

EPS = 1e-5  # same eps as the standard AdaIN calc_mean_std


def calc_mean_std_jax(feat, eps=EPS):
    """Reference of torch calc_mean_std: mean/std over H*W per (N,C),
    unbiased variance (torch.var default), eps added to var before sqrt."""
    n, c, h, w = feat.shape
    flat = feat.reshape(n, c, h * w)
    mean = jnp.mean(flat, axis=-1)
    var = jnp.sum((flat - mean[..., None]) ** 2, axis=-1) / max(h * w - 1, 1)
    std = jnp.sqrt(var + eps)
    return mean.reshape(n, c, 1, 1), std.reshape(n, c, 1, 1)


def pin_kernel(x_ref, style_ref, o_ref):
    # x_ref:     (bm, HW)  content_feat rows (one row per (n,c) pair)
    # style_ref: (bm, 2)   column 0 = style_mean, column 1 = style_std
    x = x_ref[...].astype(jnp.float32)
    hw = x.shape[-1]
    denom = hw - 1 if hw > 1 else 1  # unbiased var; guard H*W == 1

    # --- fused single-pass statistics: sum and sum-of-squares together ---
    s1 = jnp.sum(x, axis=-1, keepdims=True)
    s2 = jnp.sum(x * x, axis=-1, keepdims=True)
    mean = s1 * (1.0 / hw)
    var = (s2 - mean * s1) / denom            # == (s2 - hw*mean^2) / (hw-1)
    inv_std = jax.lax.rsqrt(var + EPS)        # EUP slot -> effectively free
    x_norm = (x - mean) * inv_std             # content_feat_norm

    # --- forward(): clamp style_std >= 0, affine, ReLU ---
    style = style_ref[...].astype(jnp.float32)
    s_mean = style[:, 0:1]
    s_std = jnp.maximum(style[:, 1:2], 0.0)
    target = x_norm * s_std + s_mean
    o_ref[...] = jnp.maximum(target, 0.0).astype(o_ref.dtype)


def _pick_block_rows(nc, hw, itemsize, target_block_bytes):
    """Pick bm so one (bm, hw) tile moves ~target_block_bytes, respecting
    sublane packing (8 for f32, 16 for bf16, 32 for int8/fp8) and keeping
    >=2 grid steps when there are enough rows (v7x has 2 TensorCores)."""
    sublane = max(8, 32 // max(1, itemsize))
    bm = target_block_bytes // max(1, hw * itemsize)
    bm = max(sublane, (bm // sublane) * sublane)
    if bm >= nc:
        if nc >= 2 * sublane:
            half = -(-nc // 2)
            bm = -(-half // sublane) * sublane   # round up to sublane multiple
        else:
            bm = nc
    return min(bm, nc)


def pin_forward(content_feat, style_mean, style_std, *,
                target_block_bytes=4 << 20):
    """content_feat: (N, C, H, W); style_mean/std: (N, C, 1, 1)."""
    n, c, h, w = content_feat.shape
    nc, hw = n * c, h * w
    itemsize = jnp.dtype(content_feat.dtype).itemsize

    # TODO(synk): for general shapes where H*W is not a multiple of 128, pad
    # the flattened spatial axis to keep output stores lane-dense (256 here
    # is already a multiple of 128).
    x2d = content_feat.reshape(nc, hw)
    # Pack both per-(n,c) style params into one (nc, 2) array -> one small DMA
    # per grid step instead of two.
    style2d = jnp.concatenate(
        [style_mean.reshape(nc, 1), style_std.reshape(nc, 1)], axis=1)

    bm = _pick_block_rows(nc, hw, itemsize, target_block_bytes)
    grid = (pl.cdiv(nc, bm),)

    # VMEM budget: double-buffered input + output tiles plus f32 compute
    # temporaries.  Capped at 48 MiB so it fits v7x's 64 MiB physical VMEM
    # (and is well under v5e/v6e's 128 MiB).
    tile_bytes = bm * hw * itemsize
    vmem_limit = int(min(48 << 20, max(32 << 20, 8 * tile_bytes)))

    out2d = pl.pallas_call(
        pin_kernel,
        out_shape=jax.ShapeDtypeStruct((nc, hw), content_feat.dtype),
        grid_spec=pltpu.PrefetchScalarGridSpec(
            num_scalar_prefetch=0,
            grid=grid,
            in_specs=[
                pl.BlockSpec((bm, hw), lambda i: (i, 0)),
                pl.BlockSpec((bm, 2), lambda i: (i, 0)),
            ],
            out_specs=pl.BlockSpec((bm, hw), lambda i: (i, 0)),
        ),
        compiler_params=pltpu.CompilerParams(
            dimension_semantics=("parallel",),
            vmem_limit_bytes=vmem_limit),
    )(x2d, style2d)

    return out2d.reshape(n, c, h, w)


def pin_reference(content_feat, style_mean, style_std):
    """Pure-JAX reference mirroring the PyTorch forward."""
    c_mean, c_std = calc_mean_std_jax(content_feat)
    norm = (content_feat - c_mean) / c_std
    s_std = jnp.maximum(style_std, 0.0)
    return jnp.maximum(norm * s_std + style_mean, 0.0)


if __name__ == "__main__":
    key = jax.random.PRNGKey(0)
    k1, k2, k3 = jax.random.split(key, 3)

    # content_feat: small NCHW feature map
    N, C, H, W = 2, 4, 16, 16
    content_feat = jax.random.normal(k1, (N, C, H, W), dtype=jnp.float32)

    # __init__: style params initialized from the content statistics, then
    # (as if after a training step) perturbed deterministically so the
    # forward is non-trivial.
    content_mean, content_std = calc_mean_std_jax(content_feat)
    style_mean = content_mean + 0.1 * jax.random.normal(
        k2, content_mean.shape, dtype=jnp.float32)
    style_std = content_std + 0.1 * jax.random.normal(
        k3, content_std.shape, dtype=jnp.float32)

    out = pin_forward(content_feat, style_mean, style_std)
    out = jax.block_until_ready(out)

    ref = pin_reference(content_feat, style_mean, style_std)
    assert out.shape == (N, C, H, W)
    assert jnp.allclose(out, ref, atol=1e-4, rtol=1e-5), (
        float(jnp.max(jnp.abs(out - ref))))

    print("KERNEL_OK")
</pallas_src>

<mosaic_0001>
module attributes {stable_mosaic.version = 11 : i64} {
  func.func @pin_kernel(%arg0: i32, %arg1: memref<8x256xf32, #tpu.memory_space<vmem>>, %arg2: memref<8x2xf32, #tpu.memory_space<vmem>>, %arg3: memref<8x256xf32, #tpu.memory_space<vmem>>) attributes {dimension_semantics = [#tpu.dimension_semantics<parallel>], iteration_bounds = array<i64: 1>, scalar_prefetch = 0 : i64, scratch_operands = 0 : i64, tpu.core_type = #tpu.core_type<tc>, window_params = [{transform_indices = @transform_0, window_bounds = array<i64: 8, 256>}, {transform_indices = @transform_1, window_bounds = array<i64: 8, 2>}, {transform_indices = @transform_2, window_bounds = array<i64: 8, 256>}]} {
    %c0 = arith.constant 0 : index
    %c0_0 = arith.constant 0 : index
    %0 = vector.load %arg1[%c0, %c0_0] : memref<8x256xf32, #tpu.memory_space<vmem>>, vector<8x256xf32>
    %cst = arith.constant dense<0.000000e+00> : vector<8xf32>
    %1 = vector.multi_reduction <add>, %0, %cst [1] : vector<8x256xf32> to vector<8xf32>
    %2 = vector.shape_cast %1 : vector<8xf32> to vector<8x1xf32>
    %3 = arith.mulf %0, %0 : vector<8x256xf32>
    %cst_1 = arith.constant dense<0.000000e+00> : vector<8xf32>
    %4 = vector.multi_reduction <add>, %3, %cst_1 [1] : vector<8x256xf32> to vector<8xf32>
    %5 = vector.shape_cast %4 : vector<8xf32> to vector<8x1xf32>
    %cst_2 = arith.constant 3.906250e-03 : f32
    %6 = vector.broadcast %cst_2 : f32 to vector<8x1xf32>
    %7 = arith.mulf %2, %6 : vector<8x1xf32>
    %8 = arith.mulf %7, %2 : vector<8x1xf32>
    %9 = arith.subf %5, %8 : vector<8x1xf32>
    %cst_3 = arith.constant 2.550000e+02 : f32
    %10 = vector.broadcast %cst_3 : f32 to vector<8x1xf32>
    %11 = arith.divf %9, %10 : vector<8x1xf32>
    %cst_4 = arith.constant 9.99999974E-6 : f32
    %12 = vector.broadcast %cst_4 : f32 to vector<8x1xf32>
    %13 = arith.addf %11, %12 : vector<8x1xf32>
    %14 = math.rsqrt %13 : vector<8x1xf32>
    %15 = vector.broadcast %7 : vector<8x1xf32> to vector<8x256xf32>
    %16 = arith.subf %0, %15 : vector<8x256xf32>
    %17 = vector.broadcast %14 : vector<8x1xf32> to vector<8x256xf32>
    %18 = arith.mulf %16, %17 : vector<8x256xf32>
    %c0_5 = arith.constant 0 : index
    %c0_6 = arith.constant 0 : index
    %19 = vector.load %arg2[%c0_5, %c0_6] : memref<8x2xf32, #tpu.memory_space<vmem>>, vector<8x2xf32>
    %20 = vector.extract_strided_slice %19 {offsets = [0, 0], sizes = [8, 1], strides = [1, 1]} : vector<8x2xf32> to vector<8x1xf32>
    %21 = vector.extract_strided_slice %19 {offsets = [0, 1], sizes = [8, 1], strides = [1, 1]} : vector<8x2xf32> to vector<8x1xf32>
    %cst_7 = arith.constant 0.000000e+00 : f32
    %22 = vector.broadcast %cst_7 : f32 to vector<8x1xf32>
    %23 = arith.maximumf %21, %22 : vector<8x1xf32>
    %24 = vector.broadcast %23 : vector<8x1xf32> to vector<8x256xf32>
    %25 = arith.mulf %18, %24 : vector<8x256xf32>
    %26 = vector.broadcast %20 : vector<8x1xf32> to vector<8x256xf32>
    %27 = arith.addf %25, %26 : vector<8x256xf32>
    %cst_8 = arith.constant 0.000000e+00 : f32
    %28 = vector.broadcast %cst_8 : f32 to vector<8x256xf32>
    %29 = arith.maximumf %27, %28 : vector<8x256xf32>
    %c0_9 = arith.constant 0 : index
    %c0_10 = arith.constant 0 : index
    %30 = vector.load %arg3[%c0_9, %c0_10] : memref<8x256xf32, #tpu.memory_space<vmem>>, vector<8x256xf32>
    tpu.vector_store %arg3[%c0_9, %c0_10], %29 {strides = array<i32>} : memref<8x256xf32, #tpu.memory_space<vmem>>, vector<8x256xf32>,
    return
  }
  func.func @transform_0(%arg0: i32) -> (i32, i32) {
    %c0_i32 = arith.constant 0 : i32
    %c0_i32_0 = arith.constant 0 : i32
    return %arg0, %c0_i32 : i32, i32
  }
  func.func @transform_1(%arg0: i32) -> (i32, i32) {
    %c0_i32 = arith.constant 0 : i32
    %c0_i32_0 = arith.constant 0 : i32
    return %arg0, %c0_i32 : i32, i32
  }
  func.func @transform_2(%arg0: i32) -> (i32, i32) {
    %c0_i32 = arith.constant 0 : i32
    %c0_i32_0 = arith.constant 0 : i32
    return %arg0, %c0_i32 : i32, i32
  }
}

</mosaic_0001>

<bundles_post_ra>
// kernel: tpu_custom_call.1
= control target key start
LH: loop header
LB: loop body
LE: loop exit
PB: predicated region body
PF: predicated region fallthrough
CT: control target
= control target key end

     0   :  { %7 = vsyncpa [#allocation3], 0  ;;  %s161_s0 = inlined_call_operand.hbm [shape: f32[8,256], index: 0, kind: input, shape index: {}]   ;;  %s162_s1 = inlined_call_operand.vmem [shape: f32[8,2], index: 1, kind: input, shape index: {}]   ;;  %s163_s2 = inlined_call_operand.hbm [shape: f32[8,256], index: 2, kind: output, shape index: {}]  }
   0x1   :  { %8 = vsyncpa [#allocation4], 0  ;;  %s133_s9 = smov [#allocation2]  }
   0x2   :  { %s15_s10 = sshll.u32 %s133_s9, 4  ;;  %s16_s10 = int_to_ptr.vmem [resolvable:$true] %s15_s10 }
   0x3   :  { %s97_s11 = scalar_lea.vmem %s16_s10, 256  ;;  %p102_p1 = scmp.lt.s32.totalorder %s16_s10, %s16_s10 }
   0x4   :  { %p98_p0 = scmp.ne.s32.totalorder %s16_s10, %s97_s11  ;;  %p103_p2 = scmp.lt.s32.totalorder %s97_s11, %s97_s11 }
   0x6   :  { %p104_p3 = por %p103_p2, %p102_p1 }
   0x8   :  { %p105_p4 = pnand %p104_p3, %p98_p0 }
   0xa   :  { %108 = shalt.err (!%p105_p4)
}
   0xb   :  { %18 = dma.hbm_to_vmem [thread:$0]  %s161_s0, 256, %s16_s10, [#allocation3]  }
   0xc   :  { %129 = dma.done.wait [#allocation3], 256  }
   0xd   :  { %130 = vsyncadd [#allocation3], 4294967040  ;;  %v134_v0 = vmov 1   ;;  %v135_v1 = vmov 0   ;;  %v24_v2 = vld [vmem:[#allocation2] sm:$0xff]  ;;  %v25_v3 = vld [vmem:[#allocation2 + $0x8] sm:$0xff] }
   0xe   :  { %84 = vset.pattern.permute.xlu1 %v134_v0  ;;  %86 = vset.pattern.permute.xlu0 %v135_v1  ;;  %v45_v4 = vld [vmem:[%s162_s1] sm:$0xff]  ;;  %v26_v5 = vadd.f32 %v25_v3, %v24_v2  ;;  %v29_v6 = vmul.f32 %v24_v2, %v24_v2  ;;  %v30_v7 = vmul.f32 %v25_v3, %v25_v3  ;;  %s136_s0 = smov [#allocation5]  }
   0xf   :  { %v46_v8 = vmax.f32 %v45_v4, 0.0  ;;  %s71_s1 = sshll.u32 %s136_s0, 4  ;;  %s72_s1 = int_to_ptr.vmem [resolvable:$true] %s71_s1 }
  0x10   :  { %27 = vadd.xlane.f32.xlu0 %v26_v5  ;;  %v31_v9 = vadd.f32 %v30_v7, %v29_v6  ;;  %s109_s16 = scalar_lea.vmem %s72_s1, 256  ;;  %p114_p6 = scmp.lt.s32.totalorder %s72_s1, %s72_s1 }
  0x11   :  { %49 = vperm.xlu1 %84, %v46_v8   ;;  %p110_p5 = scmp.ne.s32.totalorder %s72_s1, %s109_s16  ;;  %p115_p7 = scmp.lt.s32.totalorder %s109_s16, %s109_s16 }
  0x13   :  { %p116_p8 = por %p115_p7, %p114_p6 }
  0x14   :  { %32 = vadd.xlane.f32.xlu0 %v31_v9 }
  0x15   :  { %85 = vset.pattern.permute.xlu1 %v135_v1  ;;  %p117_p9 = pnand %p116_p8, %p110_p5 }
  0x16   :  { %56 = vperm.xlu1 %85, %v45_v4  }
  0x8c   :  { %v50_v17 = vpop.permute.xlu1 %49 }
  0x91   :  { %v57_v23 = vpop.permute.xlu1 %56 }
  0x99   :  { %v28_v10 = vpop.xlane.xlu0 %27 }
  0x9a   :  { %v34_v11 = vmul.f32 0.00390625, %v28_v10 }
  0x9c   :  { %v35_v12 = vmul.f32 %v34_v11, %v28_v10  ;;  %v41_v18 = vsub.f32 %v24_v2, %v34_v11  ;;  %v42_v19 = vsub.f32 %v25_v3, %v34_v11 }
  0x9d   :  { %v33_v13 = vpop.xlane.xlu0 %32 }
  0x9e   :  { %v36_v14 = vsub.f32 %v33_v13, %v35_v12 }
  0xa0   :  { %v38_v15 = vmul.f32 0.003921569, %v36_v14 }
  0xa2   :  { %v39_v16 = vadd.f32 1e-05, %v38_v15 }
  0xa4   :  { %87 = vrsqrt.f32 %v39_v16 }
  0xb1   :  { %v88_v20 = vpop.eup %87 }
  0xb2   :  { %v43_v21 = vmul.f32 %v88_v20, %v41_v18  ;;  %v44_v22 = vmul.f32 %v88_v20, %v42_v19 }
  0xb4   :  { %v52_v24 = vmul.f32 %v50_v17, %v43_v21  ;;  %v53_v25 = vmul.f32 %v50_v17, %v44_v22 }
  0xb6   :  { %v59_v26 = vadd.f32 %v57_v23, %v52_v24  ;;  %v60_v27 = vadd.f32 %v57_v23, %v53_v25 }
  0xb8   :  { %v61_v28 = vmax.f32 %v59_v26, 0.0  ;;  %v62_v29 = vmax.f32 %v60_v27, 0.0 }
  0xba   :  { %63 = vst [vmem:[#allocation5] sm:$0xff] %v61_v28  ;;  %64 = vst [vmem:[#allocation5 + $0x8] sm:$0xff] %v62_v29 }
  0xbb   :  { %120 = shalt.err (!%p117_p9)
}
  0xbc   :  { %74 = dma.vmem_to_hbm [thread:$0]  %s72_s1, 256, %s163_s2, [#allocation4]  }
  0xbd   :  { %131 = dma.done.wait [#allocation4], 256  }
  0xbe   :  { %132 = vsyncadd [#allocation4], 4294967040 }
  0xbf   :  { %78 = vsyncpa [#allocation3], 1 }
  0xc0   :  { %79 = vsyncpa [#allocation4], 1 }

</bundles_post_ra>
